<compile_context>
chip_gen: v7x
topology: tpu7x:2x2x1
jax: 0.10.0
libtpu: 0.0.40
codegen_flags: <defaults>
</compile_context>

<pallas_src>
import jax
import jax.numpy as jnp
from jax.experimental import pallas as pl
from jax.experimental.pallas import tpu as pltpu

NEG_SLOPE = 0.01   # nn.LeakyReLU default
BN_EPS = 1e-5


def _leaky(v):
    return jnp.where(v >= 0, v, NEG_SLOPE * v)


def _round_up(x, m):
    return (x + m - 1) // m * m


def _vmem_capacity_bytes():
    try:
        return int(pltpu.get_tpu_info().vmem_capacity_bytes)
    except Exception:
        return 64 * 2**20          # conservative fallback (v7x per-TC VMEM)


def _pick_block_n(n, lpe, lout, c1, c2p, cip):
    """Samples per grid step from a generation-aware VMEM budget.

    Accounts for double-buffered activations, the single-buffered weight set and the
    in-kernel f32 intermediates. Keeps >= 2 grid steps when possible (v7x dual TC)."""
    cap = _vmem_capacity_bytes()
    vmem_limit = min(int(cap * 0.85), 112 * 2**20)
    # constants are single-buffered via pl.Buffered(1)
    fixed = (5 * c1 * c2p + c1 * c2p + c2p * cip + cip * c2p) * 2 + 4 * c2p * 4
    per_sample = (
        2 * (lpe * 2 * c1 * 2)       # phase-interleaved input (bf16), double-buffered
        + 2 * (lout * c2p * 2)       # bf16 output, double-buffered
        + lout * 5 * c1 * 2          # stacked-K matmul LHS (bf16)
        + 3 * lout * c2p * 4         # h / gated h / r intermediates (f32)
    )
    budget = max(vmem_limit - fixed - (4 << 20), per_sample)
    bn = max(1, min(budget // per_sample, n))
    if n > 1:
        bn = min(bn, max(1, n // 2))   # >= 2 grid steps so both v7x TCs get work
    return int(bn), int(vmem_limit)


def bottleneck_kernel(x_ref, wconv_ref, wres_ref, wfc1_ref, wfc2_ref, bias_ref,
                      out_ref):
    # x_ref   : (Bn, Lpe, 2*C1) bf16 — padded input, stride-2 phases interleaved on
    #           lanes: lanes [0:C1] = even phase xe[j] (= x_pad[2j]), [C1:2C1] = xo[j].
    # wconv   : (5*C1, C2p) bf16 — conv taps stacked along K (k-major), BN folded in.
    # wres    : (C1, C2p)   bf16 — residual 1x1 conv, BN folded in.
    # wfc1/2  : (C2p, Cip) / (Cip, C2p) bf16 — SE pointwise convs, BN folded in.
    # bias    : (4, C2p) f32 — rows: conv, fc1, fc2, res (zero-padded to C2p lanes).
    Bn, Lout, C2p = out_ref.shape
    C1 = wres_ref.shape[0]
    Cip = wfc1_ref.shape[1]
    bias = bias_ref[...]

    # --- SE_block.conv: k=5,s=2,p=2 conv as ONE stacked-K MXU matmul -------------
    # Output position l needs taps (xe[l], xo[l], xe[l+1], xo[l+1], xe[l+2]); that is
    # the lane-concat of three contiguous sublane slices of x_ref, whose column order
    # (k-major) matches the wconv row order.
    lhs = jnp.concatenate(
        [x_ref[:, 0:Lout, :],              # taps k=0, k=1
         x_ref[:, 1:Lout + 1, :],          # taps k=2, k=3
         x_ref[:, 2:Lout + 2, 0:C1]],      # tap  k=4 (even phase only)
        axis=-1)                           # (Bn, Lout, 5*C1) bf16
    # Mosaic has no 3-D x 2-D dot_general without batch dims, so matmuls stay 2-D;
    # the (Bn, Lout) merge is a free view when Lout is sublane-aligned.
    lhs2 = lhs.reshape(Bn * Lout, 5 * C1)
    h = jnp.dot(lhs2, wconv_ref[...], preferred_element_type=jnp.float32)
    h3 = _leaky(h + bias[0:1]).reshape(Bn, Lout, C2p)        # (Bn, Lout, C2p) f32

    # --- ConvAttention: per-sample global avg pool, two 1x1 convs, sigmoid -------
    pooled = jnp.mean(h3, axis=1).astype(jnp.bfloat16)       # (Bn, C2p)
    a = _leaky(jnp.dot(pooled, wfc1_ref[...],
                       preferred_element_type=jnp.float32) + bias[1:2, :Cip])
    a = jax.nn.sigmoid(jnp.dot(a.astype(jnp.bfloat16), wfc2_ref[...],
                               preferred_element_type=jnp.float32) + bias[2:3])

    # --- residual branch: 1x1 stride-2 conv (even phase, offset 1) + ReLU --------
    xs = x_ref[:, 1:Lout + 1, 0:C1].reshape(Bn * Lout, C1)   # == x[:, ::2, :]
    r = jnp.maximum(jnp.dot(xs, wres_ref[...],
                            preferred_element_type=jnp.float32) + bias[3:4], 0.0)

    out_ref[...] = (h3 * a[:, None, :] + r.reshape(Bn, Lout, C2p)).astype(out_ref.dtype)


def bottleneck_forward(x, params, out_layout="ncl"):
    """x: [N, C1, L] (NCL, like PyTorch). Returns [N, C2, Lout] bf16 (or [N, Lout, C2]
    when out_layout == "nlc", which skips the final slice+transpose HBM pass)."""
    N, C1, L = x.shape
    K, S, P = 5, 2, 2
    Lout = (L + 2 * P - K) // S + 1          # == ceil(L/2), same for both branches
    C2 = params["c2"]
    C2p = params["w_conv"].shape[-1]
    Cip = params["w_fc1"].shape[1]
    Lpe = Lout + 2                            # per-phase padded length

    Bn, vmem_limit = _pick_block_n(N, Lpe, Lout, C1, C2p, Cip)
    Np = _round_up(N, Bn)                     # pad batch instead of shrinking Bn

    # Glue (one fused pass): NCL -> NLC, bf16, pad batch+length, then a pure reshape
    # interleaves the even/odd stride-2 phases onto lanes: [Np, Lpe, 2*C1].
    x_nlc = jnp.transpose(x, (0, 2, 1)).astype(jnp.bfloat16)
    x2 = jnp.pad(x_nlc, ((0, Np - N), (P, 2 * Lpe - (L + P)), (0, 0)))
    x2 = x2.reshape(Np, Lpe, 2 * C1)

    def _const(shape):
        z = (0,) * len(shape)
        # constant-index weights: single-buffered, DMA'd once, reused every step
        return pl.BlockSpec(shape, lambda n: z, pipeline_mode=pl.Buffered(1))

    grid = (Np // Bn,)
    out = pl.pallas_call(
        bottleneck_kernel,
        out_shape=jax.ShapeDtypeStruct((Np, Lout, C2p), jnp.bfloat16),
        grid_spec=pltpu.PrefetchScalarGridSpec(
            num_scalar_prefetch=0,
            grid=grid,
            in_specs=[
                pl.BlockSpec((Bn, Lpe, 2 * C1), lambda n: (n, 0, 0)),   # activations
                _const((5 * C1, C2p)),     # stacked conv taps
                _const((C1, C2p)),         # w_res
                _const((C2p, Cip)),        # w_fc1
                _const((Cip, C2p)),        # w_fc2
                _const((4, C2p)),          # packed biases
            ],
            out_specs=pl.BlockSpec((Bn, Lout, C2p), lambda n: (n, 0, 0)),
        ),
        compiler_params=pltpu.CompilerParams(
            dimension_semantics=("parallel",),
            vmem_limit_bytes=vmem_limit,
        ),
    )(x2, params["w_conv"], params["w_res"], params["w_fc1"],
      params["w_fc2"], params["biases"])

    out = out[:N, :, :C2]                 # drop batch + lane padding (bf16, NLC)
    if out_layout == "nlc":
        return out                         # stacked layers: avoid the extra HBM pass
    return out.transpose(0, 2, 1)          # PyTorch NCL interface


def make_params(key, c1, c2):
    """Deterministic synthetic parameters. BN (eval mode, running_mean=0,
    running_var=1) is folded: scale into the weight columns, beta as bias."""
    cint = max(c2 // 4, 16)
    c2p = _round_up(c2, 128)
    cip = _round_up(cint, 128)
    ks = jax.random.split(key, 12)

    def bn(kg, kb, c):
        gamma = 1.0 + 0.1 * jax.random.normal(kg, (c,), jnp.float32)
        beta = 0.1 * jax.random.normal(kb, (c,), jnp.float32)
        scale = gamma / jnp.sqrt(1.0 + BN_EPS)   # running_var = 1
        return scale, beta                       # running_mean = 0

    w_conv = 0.1 * jax.random.normal(ks[0], (c2, c1, 5), jnp.float32)
    w_fc1 = 0.1 * jax.random.normal(ks[1], (cint, c2), jnp.float32)
    w_fc2 = 0.1 * jax.random.normal(ks[2], (c2, cint), jnp.float32)
    w_res = 0.1 * jax.random.normal(ks[3], (c2, c1), jnp.float32)

    s_conv, b_conv = bn(ks[4], ks[5], c2)
    s_fc1, b_fc1 = bn(ks[6], ks[7], cint)
    s_fc2, b_fc2 = bn(ks[8], ks[9], c2)
    s_res, b_res = bn(ks[10], ks[11], c2)

    # conv taps stacked along K (k-major): [5*C1, C2p], BN scale folded, bf16 for MXU
    w_taps = jnp.stack([w_conv[:, :, k].T * s_conv[None, :] for k in range(5)], axis=0)
    w_taps = jnp.pad(w_taps, ((0, 0), (0, 0), (0, c2p - c2)))
    w_taps = w_taps.reshape(5 * c1, c2p).astype(jnp.bfloat16)

    w_fc1m = jnp.pad(w_fc1.T * s_fc1[None, :],
                     ((0, c2p - c2), (0, cip - cint))).astype(jnp.bfloat16)
    w_fc2m = jnp.pad(w_fc2.T * s_fc2[None, :],
                     ((0, cip - cint), (0, c2p - c2))).astype(jnp.bfloat16)
    w_resm = jnp.pad(w_res.T * s_res[None, :],
                     ((0, 0), (0, c2p - c2))).astype(jnp.bfloat16)

    def padc(v):
        return jnp.pad(v, (0, c2p - v.shape[0]))

    biases = jnp.stack([padc(b_conv), padc(b_fc1), padc(b_fc2), padc(b_res)])  # [4,C2p]

    return dict(w_conv=w_taps, w_res=w_resm, w_fc1=w_fc1m, w_fc2=w_fc2m,
                biases=biases, c2=c2)


def reference_forward(x, p):
    """Pure-JAX reference of the same math (im2col route) for validation."""
    N, C1, L = x.shape
    Lout = (L + 2 * 2 - 5) // 2 + 1
    C2 = p["c2"]
    Cip = p["w_fc1"].shape[1]

    xp = jnp.pad(x, ((0, 0), (0, 0), (2, 2))).astype(jnp.bfloat16)
    idx = 2 * jnp.arange(Lout)[:, None] + jnp.arange(5)[None, :]        # [Lout, 5]
    patches = xp[:, :, idx].transpose(0, 2, 3, 1)                       # [N,Lout,5,C1]
    patches = patches.reshape(N, Lout, 5 * C1)                          # k-major
    h = jnp.dot(patches, p["w_conv"], preferred_element_type=jnp.float32)
    h = _leaky(h + p["biases"][0])

    pooled = jnp.mean(h, axis=1).astype(jnp.bfloat16)                   # [N, C2p]
    a = _leaky(jnp.dot(pooled, p["w_fc1"], preferred_element_type=jnp.float32)
               + p["biases"][1, :Cip])
    a = jax.nn.sigmoid(jnp.dot(a.astype(jnp.bfloat16), p["w_fc2"],
                               preferred_element_type=jnp.float32) + p["biases"][2])
    h = h * a[:, None, :]

    xs = x[:, :, ::2].transpose(0, 2, 1).astype(jnp.bfloat16)           # [N, Lout, C1]
    r = jnp.maximum(jnp.dot(xs, p["w_res"], preferred_element_type=jnp.float32)
                    + p["biases"][3], 0.0)
    return (h + r)[..., :C2].transpose(0, 2, 1)


if __name__ == "__main__":
    N, C1, C2, L = 2, 4, 8, 16
    key = jax.random.PRNGKey(0)
    kx, kp = jax.random.split(key)
    x = jax.random.normal(kx, (N, C1, L), jnp.float32)
    params = make_params(kp, C1, C2)

    y = bottleneck_forward(x, params)
    jax.block_until_ready(y)

    y_ref = reference_forward(x, params)
    Lout = (L + 2 * 2 - 5) // 2 + 1
    assert y.shape == (N, C2, Lout)
    assert y.dtype == jnp.bfloat16
    err = float(jnp.max(jnp.abs(y.astype(jnp.float32) - y_ref)))
    # bf16 output -> ~0.2% relative rounding vs the f32 reference
    assert jnp.allclose(y.astype(jnp.float32), y_ref, atol=1e-2, rtol=1e-2), err
    print("KERNEL_OK")
</pallas_src>

<mosaic_0001>
module attributes {stable_mosaic.version = 11 : i64} {
  func.func @bottleneck_kernel(%arg0: i32, %arg1: memref<1x10x8xbf16, #tpu.memory_space<vmem>>, %arg2: memref<20x128xbf16, #tpu.memory_space<vmem>>, %arg3: memref<4x128xbf16, #tpu.memory_space<vmem>>, %arg4: memref<128x128xbf16, #tpu.memory_space<vmem>>, %arg5: memref<128x128xbf16, #tpu.memory_space<vmem>>, %arg6: memref<4x128xf32, #tpu.memory_space<vmem>>, %arg7: memref<1x8x128xbf16, #tpu.memory_space<vmem>>) attributes {dimension_semantics = [#tpu.dimension_semantics<parallel>], iteration_bounds = array<i64: 2>, scalar_prefetch = 0 : i64, scratch_operands = 0 : i64, tpu.core_type = #tpu.core_type<tc>, window_params = [{transform_indices = @transform_0, window_bounds = array<i64: 1, 10, 8>}, {pipeline_mode = #tpu.pipeline_mode<synchronous>, transform_indices = @transform_1, window_bounds = array<i64: 20, 128>}, {pipeline_mode = #tpu.pipeline_mode<synchronous>, transform_indices = @transform_2, window_bounds = array<i64: 4, 128>}, {pipeline_mode = #tpu.pipeline_mode<synchronous>, transform_indices = @transform_3, window_bounds = array<i64: 128, 128>}, {pipeline_mode = #tpu.pipeline_mode<synchronous>, transform_indices = @transform_4, window_bounds = array<i64: 128, 128>}, {pipeline_mode = #tpu.pipeline_mode<synchronous>, transform_indices = @transform_5, window_bounds = array<i64: 4, 128>}, {transform_indices = @transform_6, window_bounds = array<i64: 1, 8, 128>}]} {
    %c0 = arith.constant 0 : index
    %c0_0 = arith.constant 0 : index
    %0 = vector.load %arg6[%c0, %c0_0] : memref<4x128xf32, #tpu.memory_space<vmem>>, vector<4x128xf32>
    %c0_1 = arith.constant 0 : index
    %c0_2 = arith.constant 0 : index
    %c0_3 = arith.constant 0 : index
    %1 = vector.load %arg1[%c0_1, %c0_2, %c0_3] : memref<1x10x8xbf16, #tpu.memory_space<vmem>>, vector<1x8x8xbf16>
    %c0_4 = arith.constant 0 : index
    %c1 = arith.constant 1 : index
    %c0_5 = arith.constant 0 : index
    %2 = vector.load %arg1[%c0_4, %c1, %c0_5] : memref<1x10x8xbf16, #tpu.memory_space<vmem>>, vector<1x8x8xbf16>
    %c0_6 = arith.constant 0 : index
    %c2 = arith.constant 2 : index
    %c0_7 = arith.constant 0 : index
    %3 = vector.load %arg1[%c0_6, %c2, %c0_7] : memref<1x10x8xbf16, #tpu.memory_space<vmem>>, vector<1x8x4xbf16>
    %4 = tpu.concatenate %1, %2, %3 in 2 : vector<1x8x8xbf16>, vector<1x8x8xbf16>, vector<1x8x4xbf16> -> vector<1x8x20xbf16>
    %5 = vector.shape_cast %4 : vector<1x8x20xbf16> to vector<8x20xbf16>
    %c0_8 = arith.constant 0 : index
    %c0_9 = arith.constant 0 : index
    %6 = vector.load %arg2[%c0_8, %c0_9] : memref<20x128xbf16, #tpu.memory_space<vmem>>, vector<20x128xbf16>
    %cst = arith.constant dense<0.000000e+00> : vector<8x128xf32>
    %7 = tpu.matmul %5, %6, %cst {dimension_numbers = #tpu.dot_dimension_numbers<[1], [0], [0], [1], [0, 0, 1, 1], [], []>} : vector<8x20xbf16>, vector<20x128xbf16>, vector<8x128xf32> -> vector<8x128xf32>
    %8 = vector.extract_strided_slice %0 {offsets = [0, 0], sizes = [1, 128], strides = [1, 1]} : vector<4x128xf32> to vector<1x128xf32>
    %9 = vector.broadcast %8 : vector<1x128xf32> to vector<8x128xf32>
    %10 = arith.addf %7, %9 : vector<8x128xf32>
    %cst_10 = arith.constant 0.000000e+00 : f32
    %11 = vector.broadcast %cst_10 : f32 to vector<8x128xf32>
    %12 = arith.cmpf oge, %10, %11 : vector<8x128xf32>
    %cst_11 = arith.constant 0.00999999977 : f32
    %13 = vector.broadcast %cst_11 : f32 to vector<8x128xf32>
    %14 = arith.mulf %13, %10 : vector<8x128xf32>
    %15 = arith.select %12, %10, %14 : vector<8x128xi1>, vector<8x128xf32>
    %16 = vector.shape_cast %15 : vector<8x128xf32> to vector<1x8x128xf32>
    %cst_12 = arith.constant dense<0.000000e+00> : vector<1x128xf32>
    %17 = vector.multi_reduction <add>, %16, %cst_12 [1] : vector<1x8x128xf32> to vector<1x128xf32>
    %cst_13 = arith.constant 8.000000e+00 : f32
    %18 = vector.broadcast %cst_13 : f32 to vector<1x128xf32>
    %19 = arith.divf %17, %18 : vector<1x128xf32>
    %20 = arith.truncf %19 : vector<1x128xf32> to vector<1x128xbf16>
    %c0_14 = arith.constant 0 : index
    %c0_15 = arith.constant 0 : index
    %21 = vector.load %arg4[%c0_14, %c0_15] : memref<128x128xbf16, #tpu.memory_space<vmem>>, vector<128x128xbf16>
    %cst_16 = arith.constant dense<0.000000e+00> : vector<1x128xf32>
    %22 = tpu.matmul %20, %21, %cst_16 {dimension_numbers = #tpu.dot_dimension_numbers<[1], [0], [0], [1], [0, 0, 1, 1], [], []>} : vector<1x128xbf16>, vector<128x128xbf16>, vector<1x128xf32> -> vector<1x128xf32>
    %23 = vector.extract_strided_slice %0 {offsets = [1, 0], sizes = [1, 128], strides = [1, 1]} : vector<4x128xf32> to vector<1x128xf32>
    %24 = arith.addf %22, %23 : vector<1x128xf32>
    %cst_17 = arith.constant 0.000000e+00 : f32
    %25 = vector.broadcast %cst_17 : f32 to vector<1x128xf32>
    %26 = arith.cmpf oge, %24, %25 : vector<1x128xf32>
    %cst_18 = arith.constant 0.00999999977 : f32
    %27 = vector.broadcast %cst_18 : f32 to vector<1x128xf32>
    %28 = arith.mulf %27, %24 : vector<1x128xf32>
    %29 = arith.select %26, %24, %28 : vector<1x128xi1>, vector<1x128xf32>
    %30 = arith.truncf %29 : vector<1x128xf32> to vector<1x128xbf16>
    %c0_19 = arith.constant 0 : index
    %c0_20 = arith.constant 0 : index
    %31 = vector.load %arg5[%c0_19, %c0_20] : memref<128x128xbf16, #tpu.memory_space<vmem>>, vector<128x128xbf16>
    %cst_21 = arith.constant dense<0.000000e+00> : vector<1x128xf32>
    %32 = tpu.matmul %30, %31, %cst_21 {dimension_numbers = #tpu.dot_dimension_numbers<[1], [0], [0], [1], [0, 0, 1, 1], [], []>} : vector<1x128xbf16>, vector<128x128xbf16>, vector<1x128xf32> -> vector<1x128xf32>
    %33 = vector.extract_strided_slice %0 {offsets = [2, 0], sizes = [1, 128], strides = [1, 1]} : vector<4x128xf32> to vector<1x128xf32>
    %34 = arith.addf %32, %33 : vector<1x128xf32>
    %35 = arith.negf %34 : vector<1x128xf32>
    %36 = math.exp %35 : vector<1x128xf32>
    %cst_22 = arith.constant 1.000000e+00 : f32
    %37 = vector.broadcast %cst_22 : f32 to vector<1x128xf32>
    %38 = arith.addf %37, %36 : vector<1x128xf32>
    %39 = arith.divf %37, %38 : vector<1x128xf32>
    %c0_23 = arith.constant 0 : index
    %c1_24 = arith.constant 1 : index
    %c0_25 = arith.constant 0 : index
    %40 = vector.load %arg1[%c0_23, %c1_24, %c0_25] : memref<1x10x8xbf16, #tpu.memory_space<vmem>>, vector<1x8x4xbf16>
    %41 = vector.shape_cast %40 : vector<1x8x4xbf16> to vector<8x4xbf16>
    %c0_26 = arith.constant 0 : index
    %c0_27 = arith.constant 0 : index
    %42 = vector.load %arg3[%c0_26, %c0_27] : memref<4x128xbf16, #tpu.memory_space<vmem>>, vector<4x128xbf16>
    %cst_28 = arith.constant dense<0.000000e+00> : vector<8x128xf32>
    %43 = tpu.matmul %41, %42, %cst_28 {dimension_numbers = #tpu.dot_dimension_numbers<[1], [0], [0], [1], [0, 0, 1, 1], [], []>} : vector<8x4xbf16>, vector<4x128xbf16>, vector<8x128xf32> -> vector<8x128xf32>
    %44 = vector.extract_strided_slice %0 {offsets = [3, 0], sizes = [1, 128], strides = [1, 1]} : vector<4x128xf32> to vector<1x128xf32>
    %45 = vector.broadcast %44 : vector<1x128xf32> to vector<8x128xf32>
    %46 = arith.addf %43, %45 : vector<8x128xf32>
    %cst_29 = arith.constant 0.000000e+00 : f32
    %47 = vector.broadcast %cst_29 : f32 to vector<8x128xf32>
    %48 = arith.maximumf %46, %47 : vector<8x128xf32>
    %49 = vector.shape_cast %39 : vector<1x128xf32> to vector<1x1x128xf32>
    %50 = vector.broadcast %49 : vector<1x1x128xf32> to vector<1x8x128xf32>
    %51 = arith.mulf %16, %50 : vector<1x8x128xf32>
    %52 = vector.shape_cast %48 : vector<8x128xf32> to vector<1x8x128xf32>
    %53 = arith.addf %51, %52 : vector<1x8x128xf32>
    %54 = arith.truncf %53 : vector<1x8x128xf32> to vector<1x8x128xbf16>
    %c0_30 = arith.constant 0 : index
    %c0_31 = arith.constant 0 : index
    %c0_32 = arith.constant 0 : index
    %55 = vector.load %arg7[%c0_30, %c0_31, %c0_32] : memref<1x8x128xbf16, #tpu.memory_space<vmem>>, vector<1x8x128xbf16>
    tpu.vector_store %arg7[%c0_30, %c0_31, %c0_32], %54 {strides = array<i32>} : memref<1x8x128xbf16, #tpu.memory_space<vmem>>, vector<1x8x128xbf16>,
    return
  }
  func.func @transform_0(%arg0: i32) -> (i32, i32, i32) {
    %c0_i32 = arith.constant 0 : i32
    %c0_i32_0 = arith.constant 0 : i32
    %c0_i32_1 = arith.constant 0 : i32
    return %arg0, %c0_i32, %c0_i32_0 : i32, i32, i32
  }
  func.func @transform_1(%arg0: i32) -> (i32, i32) {
    %c0_i32 = arith.constant 0 : i32
    %c0_i32_0 = arith.constant 0 : i32
    %c0_i32_1 = arith.constant 0 : i32
    return %c0_i32, %c0_i32_0 : i32, i32
  }
  func.func @transform_2(%arg0: i32) -> (i32, i32) {
    %c0_i32 = arith.constant 0 : i32
    %c0_i32_0 = arith.constant 0 : i32
    %c0_i32_1 = arith.constant 0 : i32
    return %c0_i32, %c0_i32_0 : i32, i32
  }
  func.func @transform_3(%arg0: i32) -> (i32, i32) {
    %c0_i32 = arith.constant 0 : i32
    %c0_i32_0 = arith.constant 0 : i32
    %c0_i32_1 = arith.constant 0 : i32
    return %c0_i32, %c0_i32_0 : i32, i32
  }
  func.func @transform_4(%arg0: i32) -> (i32, i32) {
    %c0_i32 = arith.constant 0 : i32
    %c0_i32_0 = arith.constant 0 : i32
    %c0_i32_1 = arith.constant 0 : i32
    return %c0_i32, %c0_i32_0 : i32, i32
  }
  func.func @transform_5(%arg0: i32) -> (i32, i32) {
    %c0_i32 = arith.constant 0 : i32
    %c0_i32_0 = arith.constant 0 : i32
    %c0_i32_1 = arith.constant 0 : i32
    return %c0_i32, %c0_i32_0 : i32, i32
  }
  func.func @transform_6(%arg0: i32) -> (i32, i32, i32) {
    %c0_i32 = arith.constant 0 : i32
    %c0_i32_0 = arith.constant 0 : i32
    %c0_i32_1 = arith.constant 0 : i32
    return %arg0, %c0_i32, %c0_i32_0 : i32, i32, i32
  }
}

</mosaic_0001>

<bundles_post_ra>
// kernel: tpu_custom_call.1
= control target key start
LH: loop header
LB: loop body
LE: loop exit
PB: predicated region body
PF: predicated region fallthrough
CT: control target
= control target key end

     0   :  { %11 = vsyncpa [#allocation3], 0  ;;  %s1369_s0 = inlined_call_operand.vmem [shape: bf16[2,10,8], index: 0, kind: input, shape index: {}]   ;;  %s1370_s1 = inlined_call_operand.vmem [shape: bf16[20,128], index: 1, kind: input, shape index: {}]   ;;  %s1371_s2 = inlined_call_operand.vmem [shape: bf16[4,128], index: 2, kind: input, shape index: {}]   ;;  %s1372_s3 = inlined_call_operand.hbm [shape: bf16[128,128], index: 3, kind: input, shape index: {}]   ;;  %s1373_s4 = inlined_call_operand.hbm [shape: bf16[128,128], index: 4, kind: input, shape index: {}]   ;;  %s1374_s5 = inlined_call_operand.vmem [shape: f32[4,128], index: 5, kind: input, shape index: {}]   ;;  %s1375_s6 = inlined_call_operand.hbm [shape: bf16[2,8,128], index: 6, kind: output, shape index: {}]  }
   0x1   :  { %12 = vsyncpa [#allocation6], 0 }
   0x2   :  { %13 = vsyncpa [#allocation4], 0 }
   0x3   :  { %15 = vsyncpa [#allocation4 + $0x1], 0  ;;  %s1144_s21 = smov 0   ;;  %s1146_s22 = smov 0  }
   0x4   :  { %s1148_s23 = smov 0   ;;  %s1150_s24 = smov 0  }
   0x5 LB: > { %s1165_s25 = sadd.s32 4294967295, %s1098_s24   ;;  %s766_s26 = sadd.s32 4294967294, %s1098_s24   ;;  %s1098_s24 = sphi %s1150_s24, %s1393_s24   ;;  %s1094_s23 = sphi %s1148_s23, %s1392_s23   ;;  %s1090_s22 = sphi %s1146_s22, %s1391_s22   ;;  %s1086_s21 = sphi %s1144_s21, %s1390_s21  }
   0x6   : > { %s1169_s27 = sadd.s32 1, %s1098_s24   ;;  %s159_s28 = sadd.s32 1, %s1094_s23 }
   0x7   : > { %s156_s29 = ssub.s32 %s1098_s24, %s1169_s27  ;;  %p169_p0 = scmp.ne.s32.totalorder %s1094_s23, %s1090_s22 }
   0x8   : > { %p157_p1 = scmp.eq.s32.totalorder %s156_s29, 0  ;;  %p170_p2 = scmp.eq.s32.totalorder %s1165_s25, 1 }
   0x9   : > { %p175_p3 = scmp.ne.s32.totalorder %s1090_s22, %s1086_s21  ;;  %p176_p4 = scmp.eq.s32.totalorder %s766_s26, 1 }
   0xa   : > { %s1180_s30 = scalar_select %p157_p1, %s1094_s23, %s159_s28  }
   0xb   : > { %p1182_p5 = por %p170_p2, %p169_p0  ;;  %p1186_p6 = por %p176_p4, %p175_p3 }
   0xc   : > { %p767_p7 = scmp.ge.s32.totalorder %s1098_s24, 1  ;;  %p183_p8 = scmp.lt.s32.totalorder %s1098_s24, 3 }
   0xd   : > { %s1379_s7 = scalar_select %p1182_p5, 1, 0 }
   0xe   : > { %s1380_s8 = scalar_select %p1186_p6, 1, 0 }
   0xf   : > { %p1376_p9 = scmp.eq.s32.totalorder %s1165_s25, 0  ;;  %p1193_p10 = pnand %p767_p7, %p183_p8 }
  0x10   : > { %s1100_s10 = smov [#allocation2]   ;;  %s1101_s13 = smov [#allocation5]  }
  0x11   : > { %s1381_s9 = scalar_select %p1193_p10, 1, 0 }
  0x12   : > { %s201_s11 = sshll.u32 %s1100_s10, 4  ;;  %p892_p11 = pneg %p1193_p10  ;;  %s202_s11 = int_to_ptr.vmem [resolvable:$true] %s201_s11 }
  0x13   : > { %s214_s14 = sshll.u32 %s1101_s13, 4  ;;  %s972_s17 = scalar_lea.hbm %s1372_s3, 1024  ;;  %s1205_s14 = int_to_ptr.vmem [resolvable:$true] %s214_s14 }
  0x14   : > { %p1201_p12 = pnand %p1376_p9, %p892_p11  ;;  %p973_p13 = scmp.ne.s32.totalorder %s1372_s3, %s972_s17 }
  0x15   : > { %p979_p3 = scmp.lt.u32.totalorder %s972_s17, %s1372_s3 }
  0x16   : > { %p974_p0 = pneg %p1201_p12 }
  0x18   : > { %p975_p1 = pnand %p974_p0, %p973_p13 }
  0x1a   : > { %p976_p2 = pneg %p975_p1 }
  0x1c   : > { %p981_p4 = pnand %p979_p3, %p976_p2 }
  0x1e   : > { %984 = shalt.err (!%p981_p4)
}
  0x1f   : > { %s985_s28 = scalar_lea.vmem %s202_s11, 1024  ;;  %p993_p9 = scmp.lt.s32.totalorder %s202_s11, %s202_s11 }
  0x20   : > { %p986_p7 = scmp.ne.s32.totalorder %s202_s11, %s985_s28  ;;  %p994_p6 = scmp.lt.s32.totalorder %s985_s28, %s985_s28 }
  0x22   : > { %p988_p8 = pnand %p986_p7, %p974_p0  ;;  %p995_p5 = por %p994_p6, %p993_p9 }
  0x24   : > { %p989_p11 = pneg %p988_p8 }
  0x26   : > { %p996_p10 = pnand %p995_p5, %p989_p11 }
  0x28   : > { %999 = shalt.err (!%p996_p10)
}
  0x29   : > { %s1102_s29 = smov 64   ;;  %s1103_s10 = smov 4  }
  0x2a   : > { %895 = dma.hbm_to_vmem [thread:$0]  (!%p1201_p12), %s1372_s3, 1024, %s202_s11, [#allocation3], %s1102_s29, %s1102_s29, %s1103_s10  }
  0x2b   : > { %s1000_s18 = scalar_lea.hbm %s1373_s4, 1024 }
  0x2c   : > { %p1001_p13 = scmp.ne.s32.totalorder %s1373_s4, %s1000_s18  ;;  %p1007_p9 = scmp.lt.u32.totalorder %s1000_s18, %s1373_s4 }
  0x2e   : > { %p1003_p5 = pnand %p1001_p13, %p974_p0 }
  0x30   : > { %p1004_p6 = pneg %p1003_p5 }
  0x32   : > { %p1009_p10 = pnand %p1007_p9, %p1004_p6 }
  0x34   : > { %1012 = shalt.err (!%p1009_p10)
}
  0x35   : > { %s1013_s11 = scalar_lea.vmem %s1205_s14, 1024  ;;  %p1021_p4 = scmp.lt.s32.totalorder %s1205_s14, %s1205_s14 }
  0x36   : > { %p1014_p1 = scmp.ne.s32.totalorder %s1205_s14, %s1013_s11  ;;  %p1022_p7 = scmp.lt.s32.totalorder %s1013_s11, %s1013_s11 }
  0x38   : > { %p1016_p2 = pnand %p1014_p1, %p974_p0  ;;  %p1023_p8 = por %p1022_p7, %p1021_p4 }
  0x3a   : > { %p1017_p3 = pneg %p1016_p2 }
  0x3c   : > { %p1024_p11 = pnand %p1023_p8, %p1017_p3 }
  0x3e   : > { %1027 = shalt.err (!%p1024_p11)
}
  0x3f   : > { %898 = dma.hbm_to_vmem [thread:$0]  (!%p1201_p12), %s1373_s4, 1024, %s1205_s14, [#allocation6], %s1102_s29, %s1102_s29, %s1103_s10  }
  0x40   : > { %p1383_p13 = scmp.ne.s32.totalorder %s1381_s9, 0 }
  0x41   : > { %p1384_p5 = scmp.eq.s32.totalorder (!%p1383_p13), %s1165_s25, 0 }
  0x42   : > { %241 = sbr.rel (%p1383_p13) target bundleno = 927 (0x39f), region = 44 }
  0x49   : > { %1073 = dma.done.wait (%p1384_p5), [#allocation3], 1024   ;;  %p1385_p0 = pmov %p1384_p5 }
  0x4b   : > { %1075 = vsyncadd (%p1385_p0), [#allocation3], 4294966272  ;;  %p1386_p6 = pmov %p1385_p0 }
  0x4c   : > { %p1387_p9 = pmov %p1385_p0 }
  0x4d   : > { %1077 = dma.done.wait (%p1386_p6), [#allocation6], 1024  }
  0x4e   : > { %1079 = vsyncadd (%p1387_p9), [#allocation6], 4294966272  ;;  %p275_p10 = scmp.lt.s32.totalorder %s1165_s25, 1  ;;  %v1104_v0 = vmov 0.0   ;;  %vm1105_vm0 = vmmov 0   ;;  %v950_v5 = vld [vmem:[%s1370_s1] sm:$0xff]   ;;  %v315_v32 = vlaneseq }
  0x4f   : > { %828 = vmatprep.subr.bf16.mxu0 %v1104_v0  ;;  %836 = vmatprep.subr.bf16.mxu1 %v1104_v0  ;;  %vm331_vm1 = vcmask 1041408   ;;  %v951_v6 = vld [vmem:[%s1370_s1 + $0x8] ss:$0 sps:$4 sm:$0x33]   ;;  %v952_v7 = vld [vmem:[#allocation2] sm:$0xff]   ;;  %v954_v16 = vld [vmem:[#allocation2 + $0x10] sm:$0xff]  }
  0x50   : > { %s276_s9 = scalar_select %p275_p10, %s1165_s25, 1  ;;  %832 = vmatprep.mubr.msk.bf16.mxu0 %vm1105_vm0, %v1104_v0  ;;  %852 = vmatprep.mubr.msk.bf16.mxu1 %vm1105_vm0, %v1104_v0  ;;  %v333_v11 = vsel %vm331_vm1, %v951_v6, 0  ;;  %v953_v12 = vld [vmem:[#allocation2 + $0x8] sm:$0xff]   ;;  %vm305_vm2 = vcmask 64512   ;;  %vm309_vm3 = vcmask 130048   ;;  %vm328_vm4 = vcmask 162816  }
  0x51   : > { %829 = vmatpush3.bf16.msra.mxu0 %v950_v5  ;;  %837 = vmatpush3.bf16.msra.mxu1 %v952_v7  ;;  %s1106_s20 = smov 8   ;;  %s1107_s26 = smov 16   ;;  %v955_v21 = vld [vmem:[#allocation2 + $0x18] sm:$0xff]   ;;  %v956_v22 = vld [vmem:[#allocation2 + $0x20] sm:$0xff]   ;;  %v957_v23 = vld [vmem:[#allocation2 + $0x28] sm:$0xff]   ;;  %v1303_v33 = vshrl.u32 %v315_v32, 7 }
  0x52   : > { %s804_s12 = sshll.u32 %s276_s9, 3  ;;  %830 = vmatprep.subr.bf16.mxu0 %v1104_v0  ;;  %838 = vmatprep.subr.bf16.mxu1 %v1104_v0  ;;  %v958_v24 = vld [vmem:[#allocation2 + $0x30] sm:$0xff]   ;;  %v959_v25 = vld [vmem:[#allocation2 + $0x38] sm:$0xff]   ;;  %v960_v26 = vld [vmem:[#allocation5] sm:$0xff]   ;;  %vm615_vm6 = vcmask 31744   ;;  %s272_s9 = sand.u32 1, %s1090_s22  }
  0x53   : > { %s279_s10 = scalar_lea.vmem %s1369_s0, %s804_s12  ;;  %v961_v27 = vld [vmem:[#allocation5 + $0x8] sm:$0xff]   ;;  %v962_v28 = vld [vmem:[#allocation5 + $0x10] sm:$0xff]   ;;  %v963_v29 = vld [vmem:[#allocation5 + $0x18] sm:$0xff]   ;;  %v317_v34 = vsub.s32 0, %v1303_v33  ;;  %s774_s12 = sshll.u32 %s272_s9, 2 }
  0x54   : > { %v282_v1 = vld [vmem:[%s279_s10] sm:$0xf]  ;;  %v283_v2 = vld [vmem:[%s279_s10 + $0x4] sm:$0x1]  ;;  %v965_v31 = vld [vmem:[#allocation5 + $0x28] sm:$0xff]   ;;  %s801_s14 = sshll.u32 %s1165_s25, 6 }
  0x55   : > { %v284_v3 = vld [vmem:[%s279_s10] sm:$0xe]  ;;  %v777_v4 = vcombine.low %v282_v1, %v283_v2  ;;  %831 = vmatpush3.bf16.msra.mxu0 %v333_v11  ;;  %839 = vmatpush3.bf16.msra.mxu1 %v953_v12  ;;  %v966_v52 = vld [vmem:[#allocation5 + $0x30] sm:$0xff]   ;;  %v967_v53 = vld [vmem:[#allocation5 + $0x38] sm:$0xff]   ;;  %s274_s29 = scalar_lea.vmem [#allocation7], %s774_s12  ;;  %s1327_s18 = scalar_lea.hbm %s1375_s6, %s801_s14 }
  0x56   : > { %v778_v10 = vcombine.low %v284_v3, %v283_v2  ;;  %856 = vmatprep.subr.bf16.mxu0 %v1104_v0  ;;  %840 = vmatprep.subr.bf16.mxu1 %v1104_v0  ;;  %v964_v30 = vld [vmem:[#allocation5 + $0x20] sm:$0xff]   ;;  %s685_s10 = sshll.u32 %s274_s29, 4  ;;  %s672_s19 = scalar_lea.sflag [#allocation4], %s272_s9  ;;  %s1329_s10 = int_to_ptr.vmem [resolvable:$true] %s685_s10 }
  0x57   : > { %v291_v8 = vshrl.u32 %v777_v4, 16  ;;  %v293_v9 = vshll.u32 %v777_v4, 16  ;;  %v281_v35 = vld [vmem:[%s1374_s5] sm:$0xf]  ;;  %p1388_p1 = scmp.ne.s32.totalorder %s1379_s7, 0  ;;  %s1108_s25 = smov [#allocation7]  }
  0x58   : > { %v302_v15 = vrot.slane %v778_v10, 1  ;;  %v318_v36 = vrot.slane %v281_v35, %v317_v34  ;;  %v610_v54 = vld [vmem:[%s1371_s2] sm:$0x3]  ;;  %v452_v56 = vrot.slane %v281_v35, 1  ;;  %v562_v5 = vrot.slane %v281_v35, 2 }
  0x59   : > { %v295_v13 = vrot.slane %v293_v9, 1  ;;  %841 = vmatpush3.bf16.msra.mxu1 %v954_v16  ;;  %v620_v55 = vsel %vm331_vm1, %v610_v54, 0 }
  0x5a   : > { %842 = vmatprep.subr.bf16.mxu1 %v1104_v0 }
  0x5b   : > { %v1284_v14 = vor.u32 %v295_v13, %v291_v8 }
  0x5d   : > { %297 = vrot.lane.b32.xlu0 %v1284_v14, %s1106_s20  ;;  %843 = vmatpush3.bf16.msra.mxu1 %v955_v21  ;;  %s1028_s20 = scalar_lea.vmem %s1329_s10, 64 }
  0x5e   : > { %844 = vmatprep.subr.bf16.mxu1 %v1104_v0  ;;  %p1029_p12 = scmp.ne.s32.totalorder %s1329_s10, %s1028_s20 }
  0x60   : > { %p1030_p2 = pnand %p1029_p12, %p1388_p1 }
  0x61   : > { %303 = vrot.lane.b32.xlu0 %v302_v15, %s1107_s26  ;;  %845 = vmatpush3.bf16.msra.mxu1 %v956_v22  ;;  %s1032_s26 = sshll.u32 %s1108_s25, 4  ;;  %s1033_s26 = int_to_ptr.vmem [resolvable:$false] %s1032_s26 }
  0x62   : > { %846 = vmatprep.subr.bf16.mxu1 %v1104_v0  ;;  %p1031_p3 = pneg %p1030_p2  ;;  %s1034_s28 = scalar_lea.vmem %s1033_s26, 128 }
  0x63   : > { %p1035_p4 = scmp.lt.s32.totalorder %s1329_s10, %s1033_s26  ;;  %p1036_p7 = scmp.lt.s32.totalorder %s1034_s28, %s1028_s20 }
  0x65   : > { %847 = vmatpush3.bf16.msra.mxu1 %v957_v23  ;;  %p1037_p8 = por %p1036_p7, %p1035_p4 }
  0x66   : > { %848 = vmatprep.subr.bf16.mxu1 %v1104_v0 }
  0x67   : > { %p1038_p11 = pnand %p1037_p8, %p1031_p3 }
  0x69   : > { %849 = vmatpush3.bf16.msra.mxu1 %v958_v24 }
  0x6a   : > { %850 = vmatprep.subr.bf16.mxu1 %v1104_v0 }
  0x6d   : > { %851 = vmatpush3.bf16.msra.mxu1 %v959_v25 }
  0x6e   : > { %876 = vmatprep.subr.bf16.mxu1 %v1104_v0 }
  0xcf   : > { %v298_v17 = vpop.permute.xlu0 %297 }
  0xd0   : > { %v308_v18 = vsel %vm305_vm2, %v282_v1, %v298_v17 }
  0xd3   : > { %v304_v19 = vpop.permute.xlu0 %303 }
  0xd4   : > { %v311_v20 = vsel %vm309_vm3, %v308_v18, %v304_v19 }
  0xd5   : > { %833 = vmatmul.mubr.msk.bf16.vlgmr.msra.gmra.mrb[0].mxu0 %vm328_vm4, %v311_v20 }
  0xd6   : > { %872 = vmatprep.mubr.msk.bf16.mxu0 %vm1105_vm0, %v1104_v0  ;;  %857 = vmatpush3.bf16.msra.mxu0 %v960_v26 }
  0xd7   : > { %858 = vmatprep.subr.bf16.mxu0 %v1104_v0 }
  0xda   : > { %859 = vmatpush3.bf16.msra.mxu0 %v961_v27 }
  0xdb   : > { %860 = vmatprep.subr.bf16.mxu0 %v1104_v0 }
  0xde   : > { %861 = vmatpush3.bf16.msra.mxu0 %v962_v28 }
  0xdf   : > { %862 = vmatprep.subr.bf16.mxu0 %v1104_v0 }
  0xe2   : > { %863 = vmatpush3.bf16.msra.mxu0 %v963_v29 }
  0xe3   : > { %864 = vmatprep.subr.bf16.mxu0 %v1104_v0 }
  0xe6   : > { %865 = vmatpush3.bf16.msra.mxu0 %v964_v30 }
  0xe7   : > { %866 = vmatprep.subr.bf16.mxu0 %v1104_v0 }
  0xea   : > { %867 = vmatpush3.bf16.msra.mxu0 %v965_v31 }
  0xeb   : > { %868 = vmatprep.subr.bf16.mxu0 %v1104_v0 }
  0xee   : > { %869 = vmatpush3.bf16.msra.mxu0 %v966_v52 }
  0xef   : > { %870 = vmatprep.subr.bf16.mxu0 %v1104_v0 }
  0xf2   : > { %871 = vmatpush3.bf16.msra.mxu0 %v967_v53 }
 0x1a8   : > { %v369_v37 = vpop.f32.mrb[0].mxu0 }
 0x1a9   : > { %v370_v38 = vadd.f32 %v369_v37, %v318_v36  ;;  %v834_v39 = vpop.f32.mrb[1].mxu0 }
 0x1aa   : > { %v372_v40 = vpop.f32.mrb[2].mxu0 }
 0x1ab   : > { %vm375_vm5 = vcmp.ge.f32.partialorder %v370_v38, 0.0  ;;  %v376_v41 = vmul.f32 0.01, %v370_v38  ;;  %v835_v42 = vpop.f32.mrb[3].mxu0 }
 0x1ad   : > { %v377_v43 = vsel %vm375_vm5, %v370_v38, %v376_v41 }
 0x1ae   : > { %v378_v44 = vrot.slane %v377_v43, 4 }
 0x1b0   : > { %v379_v45 = vadd.f32 %v378_v44, %v377_v43 }
 0x1b2   : > { %v380_v46 = vrot.slane %v379_v45, 2 }
 0x1b4   : > { %v381_v47 = vadd.f32 %v380_v46, %v379_v45 }
 0x1b6   : > { %v382_v48 = vrot.slane %v381_v47, 1 }
 0x1b8   : > { %v383_v49 = vadd.f32 %v382_v48, %v381_v47 }
 0x1ba   : > { %v385_v50 = vmul.f32 0.125, %v383_v49 }
 0x1bc   : > { %v386_v51 = vpack.c.bf16 %v385_v50, %v385_v50 }
 0x1be   : > { %853 = vmatmul.mubr.bf16.vlgmr.msra.gmra.mrb[0].mxu1 %v386_v51 }
 0x1bf   : > { %878 = vmatprep.mubr.msk.bf16.mxu1 %vm1105_vm0, %v1104_v0  ;;  %877 = vmatpush3.bf16.msra.mxu1 %v620_v55 }
 0x1c6   : > { %879 = vmatmul.mubr.msk.bf16.vlgmr.msra.gmra.mrb[4].mxu1 %vm615_vm6, %v1284_v14  ;;  %v613_v14 = vsub.s32 3, %v1303_v33 }
 0x1c8   : > { %v614_v15 = vrot.slane %v281_v35, %v613_v14 }
 0x291   : > { %v488_v57 = vpop.f32.mrb[0].mxu1 }
 0x292   : > { %v489_v58 = vadd.f32 %v488_v57, %v452_v56  ;;  %v854_v59 = vpop.f32.mrb[1].mxu1 }
 0x293   : > { %v491_v60 = vpop.f32.mrb[2].mxu1 }
 0x294   : > { %vm494_vm7 = vcmp.ge.f32.partialorder %v489_v58, 0.0  ;;  %v495_v61 = vmul.f32 0.01, %v489_v58  ;;  %v855_v62 = vpop.f32.mrb[3].mxu1 }
 0x296   : > { %v496_v63 = vsel %vm494_vm7, %v489_v58, %v495_v61 }
 0x297   : > { %v497_v0 = vpack.c.bf16 %v496_v63, %v496_v63 }
 0x299   : > { %873 = vmatmul.mubr.bf16.vlgmr.msra.gmra.mrb[4].mxu0 %v497_v0  ;;  %v656_v1 = vpop.f32.mrb[4].mxu1 }
 0x29a   : > { %v880_v2 = vpop.f32.mrb[5].mxu1  ;;  %v657_v16 = vadd.f32 %v656_v1, %v614_v15 }
 0x29b   : > { %v659_v3 = vpop.f32.mrb[6].mxu1 }
 0x29c   : > { %v881_v4 = vpop.f32.mrb[7].mxu1  ;;  %v662_v18 = vmax.f32 %v657_v16, 0.0 }
 0x36c   : > { %v598_v6 = vpop.f32.mrb[4].mxu0 }
 0x36d   : > { %v599_v7 = vadd.f32 %v598_v6, %v562_v5  ;;  %v874_v8 = vpop.f32.mrb[5].mxu0 }
 0x36e   : > { %v601_v9 = vpop.f32.mrb[6].mxu0 }
 0x36f   : > { %v798_v10 = vmul.f32 -1.442695, %v599_v7  ;;  %v875_v11 = vpop.f32.mrb[7].mxu0 }
 0x371   : > { %968 = vpow2.f32 %v798_v10 }
 0x37b   : > { %v969_v12 = vpop.eup %968 }
 0x37c   : > { %v607_v13 = vadd.f32 1.0, %v969_v12 }
 0x37e   : > { %970 = vrcp.f32 %v607_v13 }
 0x388   : > { %v971_v17 = vpop.eup %970 }
 0x389   : > { %v666_v19 = vrot.slane %v971_v17, %v317_v34 }
 0x38b   : > { %v667_v20 = vmul.f32 %v666_v19, %v377_v43 }
 0x38d   : > { %v668_v21 = vadd.f32 %v667_v20, %v662_v18 }
 0x38f   : > { %v669_v22 = vpack.c.bf16 %v668_v21, %v668_v21 }
 0x391   : > { %670 = vst [vmem:[%s274_s29] sm:$0xf] %v669_v22 }
 0x392   : > { %1041 = shalt.err (!%p1038_p11)
}
 0x393   : > { %s1042_s11 = scalar_lea.hbm %s1327_s18, 64  ;;  %s1046_s9 = scalar_lea.hbm %s1375_s6, 128 }
 0x394   : > { %p1043_p13 = scmp.ne.s32.totalorder %s1327_s18, %s1042_s11  ;;  %p1047_p6 = scmp.lt.u32.totalorder %s1327_s18, %s1375_s6 }
 0x395   : > { %p1048_p9 = scmp.lt.u32.totalorder %s1046_s9, %s1042_s11  ;;  %p1050_p12 = scmp.lt.u32.totalorder %s1042_s11, %s1327_s18 }
 0x396   : > { %p1044_p5 = pnand %p1043_p13, %p1388_p1 }
 0x397   : > { %p1049_p10 = por %p1048_p9, %p1047_p6 }
 0x398   : > { %p1045_p0 = pneg %p1044_p5 }
 0x399   : > { %p1051_p2 = por %p1050_p12, %p1049_p10 }
 0x39b   : > { %p1052_p3 = pnand %p1051_p2, %p1045_p0 }
 0x39d   : > { %1055 = shalt.err (!%p1052_p3)
}
 0x39e   : > { %890 = dma.vmem_to_hbm [thread:$0]  (%p1388_p1), %s1329_s10, 64, %s1327_s18, %s672_s19  }
 0x39f PF: > { %p907_p4 = scmp.ge.s32.totalorder %s1098_s24, 2  ;;  %s697_s29 = sand.u32 1, %s1086_s21  }
 0x3a0   : > { %p1389_p7 = scmp.ne.s32.totalorder %s1380_s8, 0  ;;  %s698_s16 = scalar_lea.sflag [#allocation4], %s697_s29 }
 0x3a2   : > { %p900_p8 = pnand %p907_p4, %p1389_p7 }
 0x3a4   : > { %1081 = dma.done.wait (!%p900_p8), %s698_s16, 64  }
 0x3a5   : > { %1083 = vsyncadd (!%p900_p8), %s698_s16, 4294967232  ;;  %p18_p11 = scmp.ge.s32.totalorder %s1169_s27, 4   ;;  %s1390_s21 = smov %s1090_s22 }
 0x3a6   : > { %s1391_s22 = smov %s1094_s23  ;;  %s1392_s23 = smov %s1180_s30 }
 0x3a7   : > { %s1393_s24 = smov %s1169_s27  ;;  %20 = sbr.rel (!%p18_p11) target bundleno = 5 (0x5), region = 88 }
 0x3ae   :  { %703 = vsyncpa [#allocation3], 1 }
 0x3af   :  { %705 = vsyncpa [#allocation3 + $0x1], 1 }
 0x3b0   :  { %706 = vsyncpa [#allocation6], 1 }
 0x3b1   :  { %707 = vsyncpa [#allocation4], 1 }
 0x3b2   :  { %709 = vsyncpa [#allocation4 + $0x1], 1 }

</bundles_post_ra>
